<compile_context>
chip_gen: v6e
topology: v6e:2x2x1
jax: 0.10.0
libtpu: 0.0.40
codegen_flags: <defaults>
</compile_context>

<pallas_src>
import jax
import jax.numpy as jnp
from jax.experimental import pallas as pl
from jax.experimental.pallas import tpu as pltpu

LANE = 128  # TPU lane width


def _round_up(x, m):
    return (x + m - 1) // m * m


def _choose_tile_b(B):
    """Row-tile size: aim for >=4 grid steps (even count -> both v7x TCs get >=2
    steps each), cap at 512 rows, keep a multiple of 16 for bf16 sublane packing."""
    return int(min(512, max(64, _round_up(-(-B // 4), 16))))


def attn_kernel(q_ref, k_ref,
                waq_ref, wak_ref, ba_ref,
                wcq_ref, vfold_ref, bc_ref,
                out_ref, attnw_ref):
    q = q_ref[...]                                   # (TILE_B, Dq) bf16
    k = k_ref[...]                                   # (TILE_B, Dk) bf16

    # attn layer: logits = cat(q,k) @ Wa + ba via split weights (no concat, Q read once).
    logits = (jnp.dot(q, waq_ref[...], preferred_element_type=jnp.float32)
              + jnp.dot(k, wak_ref[...], preferred_element_type=jnp.float32)
              + ba_ref[...])                         # (TILE_B, V1p) f32

    # softmax over value_size1; padded columns carry -1e30 bias -> exp == 0 exactly.
    m = jnp.max(logits, axis=1, keepdims=True)
    e = jnp.exp(logits - m)
    w = e * pl.reciprocal(jnp.sum(e, axis=1, keepdims=True), approx=True)
    attnw_ref[...] = w                               # lane-dense f32 store

    # combine layer with V folded in: cat(q, w@V) @ Wc + bc == q@Wc_q + w@(V@Wc_v) + bc.
    out_ref[...] = (jnp.dot(q, wcq_ref[...], preferred_element_type=jnp.float32)
                    + jnp.dot(w.astype(vfold_ref.dtype), vfold_ref[...],
                              preferred_element_type=jnp.float32)
                    + bc_ref[...])                   # lane-dense f32 store


def init_params(key, query_size, key_size, value_size1, value_size2, output_size):
    """Raw synthetic parameters with the same shapes as the nn.Linear layers."""
    ks = jax.random.split(key, 4)
    wa = 0.1 * jax.random.normal(ks[0], (query_size + key_size, value_size1), jnp.float32)
    ba = 0.1 * jax.random.normal(ks[1], (value_size1,), jnp.float32)
    wc = 0.1 * jax.random.normal(ks[2], (query_size + value_size2, output_size), jnp.float32)
    bc = 0.1 * jax.random.normal(ks[3], (output_size,), jnp.float32)
    return {"wa": wa, "ba": ba, "wc": wc, "bc": bc}


def pack_params(params, query_size, key_size, value_size1, value_size2, output_size):
    """One-time weight packing: split, pad to 128-lane-dense N dims, cast MXU operands bf16."""
    V1p = _round_up(value_size1, LANE)
    Op = _round_up(output_size, LANE)
    wa, ba, wc, bc = params["wa"], params["ba"], params["wc"], params["bc"]

    # attn layer, split into Q-half / K-half; zero-pad columns; padded bias = -1e30.
    wa_q = jnp.zeros((query_size, V1p), jnp.float32).at[:, :value_size1].set(wa[:query_size])
    wa_k = jnp.zeros((key_size, V1p), jnp.float32).at[:, :value_size1].set(wa[query_size:])
    ba_p = jnp.full((1, V1p), -1e30, jnp.float32).at[:, :value_size1].set(ba)

    # combine layer split into Q-half / applied-half, zero-padded output columns.
    wc_q = jnp.zeros((query_size, Op), jnp.float32).at[:, :output_size].set(wc[:query_size])
    wc_v = jnp.zeros((value_size2, Op), jnp.float32).at[:, :output_size].set(wc[query_size:])
    bc_p = jnp.zeros((1, Op), jnp.float32).at[:, :output_size].set(bc)

    return {"wa_q": wa_q.astype(jnp.bfloat16),
            "wa_k": wa_k.astype(jnp.bfloat16),
            "ba": ba_p,
            "wc_q": wc_q.astype(jnp.bfloat16),
            "wc_v": wc_v,                 # kept f32: used for the per-call V fold
            "bc": bc_p,
            "V1p": V1p, "Op": Op}


def attn_forward(Q, K, V, packed, value_size1, output_size):
    """Q: (1,B,Dq), K: (1,B,Dk), V: (1,V1,V2) -> (output (1,B,O), attn_weights (B,V1))."""
    q0, k0, v0 = Q[0], K[0], V[0]
    B, Dq = q0.shape
    Dk = k0.shape[1]
    V1, V2 = v0.shape
    V1p, Op = packed["V1p"], packed["Op"]

    # Fold V into the combine weight (per call, tiny XLA matmul, f32 then bf16).
    v_p = jnp.zeros((V1p, V2), jnp.float32).at[:V1, :].set(v0.astype(jnp.float32))
    v_fold = (v_p @ packed["wc_v"]).astype(jnp.bfloat16)           # (V1p, Op)

    # Streamed row inputs as bf16 MXU operands (softmax / accumulation stay f32).
    q_b = q0.astype(jnp.bfloat16)
    k_b = k0.astype(jnp.bfloat16)

    TILE_B = _choose_tile_b(B)
    Bp = _round_up(B, TILE_B)
    if Bp != B:
        q_b = jnp.zeros((Bp, Dq), jnp.bfloat16).at[:B].set(q_b)
        k_b = jnp.zeros((Bp, Dk), jnp.bfloat16).at[:B].set(k_b)

    grid = (Bp // TILE_B,)
    out_pad, attnw_pad = pl.pallas_call(
        attn_kernel,
        out_shape=(jax.ShapeDtypeStruct((Bp, Op), jnp.float32),
                   jax.ShapeDtypeStruct((Bp, V1p), jnp.float32)),
        grid_spec=pltpu.PrefetchScalarGridSpec(
            num_scalar_prefetch=0,
            grid=grid,
            in_specs=[
                pl.BlockSpec((TILE_B, Dq), lambda i: (i, 0)),    # q row tile (streamed)
                pl.BlockSpec((TILE_B, Dk), lambda i: (i, 0)),    # k row tile (streamed)
                pl.BlockSpec((Dq, V1p), lambda i: (0, 0)),       # Wa_q   (resident)
                pl.BlockSpec((Dk, V1p), lambda i: (0, 0)),       # Wa_k   (resident)
                pl.BlockSpec((1, V1p), lambda i: (0, 0)),        # ba     (resident)
                pl.BlockSpec((Dq, Op), lambda i: (0, 0)),        # Wc_q   (resident)
                pl.BlockSpec((V1p, Op), lambda i: (0, 0)),       # V_fold (resident)
                pl.BlockSpec((1, Op), lambda i: (0, 0)),         # bc     (resident)
            ],
            out_specs=[
                pl.BlockSpec((TILE_B, Op), lambda i: (i, 0)),
                pl.BlockSpec((TILE_B, V1p), lambda i: (i, 0)),
            ],
        ),
        compiler_params=pltpu.CompilerParams(
            dimension_semantics=("parallel",)),
    )(q_b, k_b,
      packed["wa_q"], packed["wa_k"], packed["ba"],
      packed["wc_q"], v_fold, packed["bc"])

    output = out_pad[:B, :output_size][None]       # (1, B, O)
    attn_w = attnw_pad[:B, :value_size1]           # (B, V1)
    return output, attn_w


def attn_forward_ref(Q, K, V, params):
    """Pure-JAX reference matching the PyTorch forward exactly (f32 throughout)."""
    q0, k0, v0 = Q[0], K[0], V[0]
    logits = jnp.concatenate([q0, k0], axis=1) @ params["wa"] + params["ba"]
    w = jax.nn.softmax(logits, axis=1)
    applied = w @ v0
    out = jnp.concatenate([q0, applied], axis=1) @ params["wc"] + params["bc"]
    return out[None], w


if __name__ == "__main__":
    # Shapes consistent with the module (feature dims 32); B sized so the adaptive
    # row tiling produces a 4-step parallel grid (64 rows per step).
    query_size, key_size = 32, 32
    value_size1, value_size2 = 32, 32
    output_size = 32
    B = 256

    root = jax.random.PRNGKey(0)
    kq, kk, kv, kp = jax.random.split(root, 4)

    Q = jax.random.normal(kq, (1, B, query_size), jnp.float32)
    K = jax.random.normal(kk, (1, B, key_size), jnp.float32)
    V = jax.random.normal(kv, (1, value_size1, value_size2), jnp.float32)

    params = init_params(kp, query_size, key_size, value_size1, value_size2, output_size)
    packed = pack_params(params, query_size, key_size, value_size1, value_size2, output_size)

    out, attn_w = attn_forward(Q, K, V, packed, value_size1, output_size)
    out = jax.block_until_ready(out)
    attn_w = jax.block_until_ready(attn_w)

    # Sanity check against the f32 pure-JAX reference.  Tolerances account for the
    # bf16 MXU operands (rel. quantization ~2^-9) and the EUP approximate reciprocal.
    out_ref, attn_w_ref = attn_forward_ref(Q, K, V, params)
    assert out.shape == (1, B, output_size)
    assert attn_w.shape == (B, value_size1)
    assert jnp.allclose(attn_w, attn_w_ref, atol=1e-2, rtol=1e-2)
    assert jnp.allclose(out, out_ref, atol=2e-2, rtol=2e-2)

    print("KERNEL_OK")
</pallas_src>

<mosaic_0001>
module attributes {stable_mosaic.version = 11 : i64} {
  func.func @attn_kernel(%arg0: i32, %arg1: memref<64x32xbf16, #tpu.memory_space<vmem>>, %arg2: memref<64x32xbf16, #tpu.memory_space<vmem>>, %arg3: memref<32x128xbf16, #tpu.memory_space<vmem>>, %arg4: memref<32x128xbf16, #tpu.memory_space<vmem>>, %arg5: memref<1x128xf32, #tpu.memory_space<vmem>>, %arg6: memref<32x128xbf16, #tpu.memory_space<vmem>>, %arg7: memref<128x128xbf16, #tpu.memory_space<vmem>>, %arg8: memref<1x128xf32, #tpu.memory_space<vmem>>, %arg9: memref<64x128xf32, #tpu.memory_space<vmem>>, %arg10: memref<64x128xf32, #tpu.memory_space<vmem>>) attributes {dimension_semantics = [#tpu.dimension_semantics<parallel>], iteration_bounds = array<i64: 4>, scalar_prefetch = 0 : i64, scratch_operands = 0 : i64, tpu.core_type = #tpu.core_type<tc>, window_params = [{transform_indices = @transform_0, window_bounds = array<i64: 64, 32>}, {transform_indices = @transform_1, window_bounds = array<i64: 64, 32>}, {pipeline_mode = #tpu.pipeline_mode<synchronous>, transform_indices = @transform_2, window_bounds = array<i64: 32, 128>}, {pipeline_mode = #tpu.pipeline_mode<synchronous>, transform_indices = @transform_3, window_bounds = array<i64: 32, 128>}, {pipeline_mode = #tpu.pipeline_mode<synchronous>, transform_indices = @transform_4, window_bounds = array<i64: 1, 128>}, {pipeline_mode = #tpu.pipeline_mode<synchronous>, transform_indices = @transform_5, window_bounds = array<i64: 32, 128>}, {pipeline_mode = #tpu.pipeline_mode<synchronous>, transform_indices = @transform_6, window_bounds = array<i64: 128, 128>}, {pipeline_mode = #tpu.pipeline_mode<synchronous>, transform_indices = @transform_7, window_bounds = array<i64: 1, 128>}, {transform_indices = @transform_8, window_bounds = array<i64: 64, 128>}, {transform_indices = @transform_9, window_bounds = array<i64: 64, 128>}]} {
    %c0 = arith.constant 0 : index
    %c0_0 = arith.constant 0 : index
    %0 = vector.load %arg1[%c0, %c0_0] : memref<64x32xbf16, #tpu.memory_space<vmem>>, vector<64x32xbf16>
    %c0_1 = arith.constant 0 : index
    %c0_2 = arith.constant 0 : index
    %1 = vector.load %arg2[%c0_1, %c0_2] : memref<64x32xbf16, #tpu.memory_space<vmem>>, vector<64x32xbf16>
    %c0_3 = arith.constant 0 : index
    %c0_4 = arith.constant 0 : index
    %2 = vector.load %arg3[%c0_3, %c0_4] : memref<32x128xbf16, #tpu.memory_space<vmem>>, vector<32x128xbf16>
    %cst = arith.constant dense<0.000000e+00> : vector<64x128xf32>
    %3 = tpu.matmul %0, %2, %cst {dimension_numbers = #tpu.dot_dimension_numbers<[1], [0], [0], [1], [0, 0, 1, 1], [], []>} : vector<64x32xbf16>, vector<32x128xbf16>, vector<64x128xf32> -> vector<64x128xf32>
    %c0_5 = arith.constant 0 : index
    %c0_6 = arith.constant 0 : index
    %4 = vector.load %arg4[%c0_5, %c0_6] : memref<32x128xbf16, #tpu.memory_space<vmem>>, vector<32x128xbf16>
    %cst_7 = arith.constant dense<0.000000e+00> : vector<64x128xf32>
    %5 = tpu.matmul %1, %4, %cst_7 {dimension_numbers = #tpu.dot_dimension_numbers<[1], [0], [0], [1], [0, 0, 1, 1], [], []>} : vector<64x32xbf16>, vector<32x128xbf16>, vector<64x128xf32> -> vector<64x128xf32>
    %6 = arith.addf %3, %5 : vector<64x128xf32>
    %c0_8 = arith.constant 0 : index
    %c0_9 = arith.constant 0 : index
    %7 = vector.load %arg5[%c0_8, %c0_9] : memref<1x128xf32, #tpu.memory_space<vmem>>, vector<1x128xf32>
    %8 = vector.broadcast %7 : vector<1x128xf32> to vector<64x128xf32>
    %9 = arith.addf %6, %8 : vector<64x128xf32>
    %cst_10 = arith.constant dense<0xFF800000> : vector<64xf32>
    %10 = vector.multi_reduction <maximumf>, %9, %cst_10 [1] : vector<64x128xf32> to vector<64xf32>
    %11 = vector.shape_cast %10 : vector<64xf32> to vector<64x1xf32>
    %12 = vector.broadcast %11 : vector<64x1xf32> to vector<64x128xf32>
    %13 = arith.subf %9, %12 : vector<64x128xf32>
    %14 = math.exp %13 : vector<64x128xf32>
    %cst_11 = arith.constant dense<0.000000e+00> : vector<64xf32>
    %15 = vector.multi_reduction <add>, %14, %cst_11 [1] : vector<64x128xf32> to vector<64xf32>
    %16 = vector.shape_cast %15 : vector<64xf32> to vector<64x1xf32>
    %17 = tpu.reciprocal %16 {approx = true} : vector<64x1xf32> -> vector<64x1xf32>
    %18 = vector.broadcast %17 : vector<64x1xf32> to vector<64x128xf32>
    %19 = arith.mulf %14, %18 : vector<64x128xf32>
    %c0_12 = arith.constant 0 : index
    %c0_13 = arith.constant 0 : index
    %20 = vector.load %arg10[%c0_12, %c0_13] : memref<64x128xf32, #tpu.memory_space<vmem>>, vector<64x128xf32>
    tpu.vector_store %arg10[%c0_12, %c0_13], %19 {strides = array<i32>} : memref<64x128xf32, #tpu.memory_space<vmem>>, vector<64x128xf32>,
    %c0_14 = arith.constant 0 : index
    %c0_15 = arith.constant 0 : index
    %21 = vector.load %arg6[%c0_14, %c0_15] : memref<32x128xbf16, #tpu.memory_space<vmem>>, vector<32x128xbf16>
    %cst_16 = arith.constant dense<0.000000e+00> : vector<64x128xf32>
    %22 = tpu.matmul %0, %21, %cst_16 {dimension_numbers = #tpu.dot_dimension_numbers<[1], [0], [0], [1], [0, 0, 1, 1], [], []>} : vector<64x32xbf16>, vector<32x128xbf16>, vector<64x128xf32> -> vector<64x128xf32>
    %23 = arith.truncf %19 : vector<64x128xf32> to vector<64x128xbf16>
    %c0_17 = arith.constant 0 : index
    %c0_18 = arith.constant 0 : index
    %24 = vector.load %arg7[%c0_17, %c0_18] : memref<128x128xbf16, #tpu.memory_space<vmem>>, vector<128x128xbf16>
    %cst_19 = arith.constant dense<0.000000e+00> : vector<64x128xf32>
    %25 = tpu.matmul %23, %24, %cst_19 {dimension_numbers = #tpu.dot_dimension_numbers<[1], [0], [0], [1], [0, 0, 1, 1], [], []>} : vector<64x128xbf16>, vector<128x128xbf16>, vector<64x128xf32> -> vector<64x128xf32>
    %26 = arith.addf %22, %25 : vector<64x128xf32>
    %c0_20 = arith.constant 0 : index
    %c0_21 = arith.constant 0 : index
    %27 = vector.load %arg8[%c0_20, %c0_21] : memref<1x128xf32, #tpu.memory_space<vmem>>, vector<1x128xf32>
    %28 = vector.broadcast %27 : vector<1x128xf32> to vector<64x128xf32>
    %29 = arith.addf %26, %28 : vector<64x128xf32>
    %c0_22 = arith.constant 0 : index
    %c0_23 = arith.constant 0 : index
    %30 = vector.load %arg9[%c0_22, %c0_23] : memref<64x128xf32, #tpu.memory_space<vmem>>, vector<64x128xf32>
    tpu.vector_store %arg9[%c0_22, %c0_23], %29 {strides = array<i32>} : memref<64x128xf32, #tpu.memory_space<vmem>>, vector<64x128xf32>,
    return
  }
  func.func @transform_0(%arg0: i32) -> (i32, i32) {
    %c0_i32 = arith.constant 0 : i32
    %c0_i32_0 = arith.constant 0 : i32
    return %arg0, %c0_i32 : i32, i32
  }
  func.func @transform_1(%arg0: i32) -> (i32, i32) {
    %c0_i32 = arith.constant 0 : i32
    %c0_i32_0 = arith.constant 0 : i32
    return %arg0, %c0_i32 : i32, i32
  }
  func.func @transform_2(%arg0: i32) -> (i32, i32) {
    %c0_i32 = arith.constant 0 : i32
    %c0_i32_0 = arith.constant 0 : i32
    %c0_i32_1 = arith.constant 0 : i32
    return %c0_i32, %c0_i32_0 : i32, i32
  }
  func.func @transform_3(%arg0: i32) -> (i32, i32) {
    %c0_i32 = arith.constant 0 : i32
    %c0_i32_0 = arith.constant 0 : i32
    %c0_i32_1 = arith.constant 0 : i32
    return %c0_i32, %c0_i32_0 : i32, i32
  }
  func.func @transform_4(%arg0: i32) -> (i32, i32) {
    %c0_i32 = arith.constant 0 : i32
    %c0_i32_0 = arith.constant 0 : i32
    %c0_i32_1 = arith.constant 0 : i32
    return %c0_i32, %c0_i32_0 : i32, i32
  }
  func.func @transform_5(%arg0: i32) -> (i32, i32) {
    %c0_i32 = arith.constant 0 : i32
    %c0_i32_0 = arith.constant 0 : i32
    %c0_i32_1 = arith.constant 0 : i32
    return %c0_i32, %c0_i32_0 : i32, i32
  }
  func.func @transform_6(%arg0: i32) -> (i32, i32) {
    %c0_i32 = arith.constant 0 : i32
    %c0_i32_0 = arith.constant 0 : i32
    %c0_i32_1 = arith.constant 0 : i32
    return %c0_i32, %c0_i32_0 : i32, i32
  }
  func.func @transform_7(%arg0: i32) -> (i32, i32) {
    %c0_i32 = arith.constant 0 : i32
    %c0_i32_0 = arith.constant 0 : i32
    %c0_i32_1 = arith.constant 0 : i32
    return %c0_i32, %c0_i32_0 : i32, i32
  }
  func.func @transform_8(%arg0: i32) -> (i32, i32) {
    %c0_i32 = arith.constant 0 : i32
    %c0_i32_0 = arith.constant 0 : i32
    return %arg0, %c0_i32 : i32, i32
  }
  func.func @transform_9(%arg0: i32) -> (i32, i32) {
    %c0_i32 = arith.constant 0 : i32
    %c0_i32_0 = arith.constant 0 : i32
    return %arg0, %c0_i32 : i32, i32
  }
}

</mosaic_0001>

<bundles_post_ra>
// kernel: tpu_custom_call.1
= control target key start
LH: loop header
LB: loop body
LE: loop exit
PB: predicated region body
PF: predicated region fallthrough
CT: control target
= control target key end

     0   :  { %15 = vsyncpa [#allocation3], 0  ;;  %s1752_s0 = inlined_call_operand.vmem [shape: bf16[256,32], index: 0, kind: input, shape index: {}]   ;;  %s1753_s1 = inlined_call_operand.vmem [shape: bf16[256,32], index: 1, kind: input, shape index: {}]   ;;  %s1754_s2 = inlined_call_operand.vmem [shape: bf16[32,128], index: 2, kind: input, shape index: {}]   ;;  %s1755_s3 = inlined_call_operand.vmem [shape: bf16[32,128], index: 3, kind: input, shape index: {}]   ;;  %s1756_s4 = inlined_call_operand.vmem [shape: f32[1,128], index: 4, kind: input, shape index: {}]   ;;  %s1757_s5 = inlined_call_operand.vmem [shape: bf16[32,128], index: 5, kind: input, shape index: {}]   ;;  %s1758_s6 = inlined_call_operand.vmem [shape: bf16[128,128], index: 6, kind: input, shape index: {}]   ;;  %s1759_s7 = inlined_call_operand.vmem [shape: f32[1,128], index: 7, kind: input, shape index: {}]   ;;  %s1760_s8 = inlined_call_operand.hbm [shape: f32[256,128], index: 8, kind: output, shape index: {0}]   ;;  %s1761_s9 = inlined_call_operand.hbm [shape: f32[256,128], index: 9, kind: output, shape index: {1}]  }
   0x1   :  { %17 = vsyncpa [#allocation3 + $0x1], 0 }
   0x2   :  { %18 = vsyncpa [#allocation5], 0 }
   0x3   :  { %20 = vsyncpa [#allocation5 + $0x1], 0  ;;  %s1477_s30 = smov 0   ;;  %s1479_s10 = smov 0  }
   0x4   :  { %s1481_s11 = smov 0   ;;  %s1483_s12 = smov 0  }
   0x5 LB: > { %s1498_s13 = sadd.s32 4294967295, %s1421_s12   ;;  %s1085_s14 = sadd.s32 4294967294, %s1421_s12   ;;  %s1421_s12 = sphi %s1483_s12, %s1774_s12   ;;  %s1417_s11 = sphi %s1481_s11, %s1773_s11   ;;  %s1413_s10 = sphi %s1479_s10, %s1772_s10   ;;  %s1409_s30 = sphi %s1477_s30, %s1771_s30  }
   0x6   : > { %s1502_s15 = sadd.s32 1, %s1421_s12   ;;  %s211_s16 = sadd.s32 1, %s1417_s11 }
   0x7   : > { %s208_s17 = ssub.s32 %s1421_s12, %s1502_s15  ;;  %p221_p0 = scmp.ne.s32.totalorder %s1417_s11, %s1413_s10 }
   0x8   : > { %p209_p1 = scmp.eq.s32.totalorder %s208_s17, 0  ;;  %p222_p2 = scmp.eq.s32.totalorder %s1498_s13, 3 }
   0x9   : > { %p227_p3 = scmp.ne.s32.totalorder %s1413_s10, %s1409_s30  ;;  %p228_p4 = scmp.eq.s32.totalorder %s1085_s14, 3 }
   0xa   : > { %s1513_s18 = scalar_select %p209_p1, %s1417_s11, %s211_s16  }
   0xb   : > { %p1515_p5 = por %p222_p2, %p221_p0  ;;  %p1519_p6 = por %p228_p4, %p227_p3 }
   0xc   : > { %p1088_p7 = scmp.ge.s32.totalorder %s1421_s12, 1  ;;  %p308_p8 = scmp.lt.s32.totalorder %s1421_s12, 5 }
   0xe   : > { %p309_p9 = pnand %p1088_p7, %p308_p8 }
   0xf   : > { %s1091_s23 = sshll.u32 (!%p309_p9), %s1498_s13, 3  ;;  %s1626_s24 = sand.u32 (!%p309_p9), 1, %s1413_s10  }
  0x10   : > { %312 = sbr.rel (%p309_p9) target bundleno = 775 (0x307), region = 52  ;;  %p355_p10 = scmp.lt.s32.totalorder (!%p309_p9), %s1091_s23, 31 }
  0x11   : > { %s1763_s26 = sshll.u32 (!%p309_p9), %s1498_s13, 10 }
  0x12   : > { %s1655_s29 = scalar_lea.hbm (!%p309_p9), %s1761_s9, %s1763_s26 }
  0x15   : > { %v1277_v0 = vld [vmem:[%s1755_s3 + $0x8] sm:$0xff]   ;;  %v1279_v2 = vld [vmem:[%s1755_s3] sm:$0xff]   ;;  %s1776_s23 = smov (!%p355_p10, %s1091_s23), 31  ;;  %vm425_vm0 = vcmask 261120   ;;  %v1289_v45 = vld [vmem:[%s1758_s6 + $0x38] sm:$0xff]  }
  0x16   : > { %v1278_v1 = vld [vmem:[%s1754_s2 + $0x8] sm:$0xff]   ;;  %1171 = vmatprep.subr.bf16.mxu0 %v1277_v0  ;;  %v1280_v3 = vld [vmem:[%s1754_s2] sm:$0xff]   ;;  %s1092_s14 = sshll.u32 %s1776_s23, 2  ;;  %v1290_v46 = vld [vmem:[%s1758_s6 + $0x30] sm:$0xff]  }
  0x17   : > { %1183 = vmatprep.subr.bf16.mxu1 %v1278_v1  ;;  %1172 = vmatpush3.bf16.msra.mxu0 %v1277_v0  ;;  %s364_s21 = scalar_lea.vmem %s1753_s1, %s1092_s14  ;;  %s358_s25 = scalar_lea.vmem %s1752_s0, %s1092_s14  ;;  %v1115_v14 = vld [vmem:[%s1756_s4] ss:$0 sm:$0xff] }
  0x18   : > { %1184 = vmatpush3.bf16.msra.mxu1 %v1278_v1  ;;  %1173 = vmatprep.subr.bf16.mxu0 %v1279_v2  ;;  %v1281_v4 = vld [vmem:[%s364_s21] sm:$0xff]   ;;  %v1283_v6 = vld [vmem:[%s364_s21 + $0x8] sm:$0xff]   ;;  %v1285_v8 = vld [vmem:[%s364_s21 + $0x10] sm:$0xff]  }
  0x19   : > { %1185 = vmatprep.subr.bf16.mxu1 %v1280_v3  ;;  %v1282_v5 = vld [vmem:[%s358_s25] sm:$0xff]   ;;  %1175 = vmatprep.mubr.msk.bf16.mxu0 %vm425_vm0, %v1281_v4  ;;  %v1546_v7 = vld [vmem:[%s358_s25 + $0x8] sm:$0xff]   ;;  %v1551_v9 = vld [vmem:[%s358_s25 + $0x10] sm:$0xff]  }
  0x1a   : > { %1187 = vmatprep.mubr.msk.bf16.mxu1 %vm425_vm0, %v1282_v5  ;;  %v1287_v10 = vld [vmem:[%s364_s21 + $0x18] sm:$0xff]   ;;  %s1423_s21 = smov [#allocation4]  }
  0x1b   : > { %1174 = vmatpush3.bf16.msra.mxu0 %v1279_v2  ;;  %v1556_v11 = vld [vmem:[%s358_s25 + $0x18] sm:$0xff]   ;;  %s1762_s25 = sshll.u32 %s1626_s24, 6  ;;  %s1335_s22 = sshll.u32 %s1423_s21, 4  ;;  %s1336_s22 = int_to_ptr.vmem [resolvable:$false] %s1335_s22 }
  0x1c   : > { %1186 = vmatpush3.bf16.msra.mxu1 %v1280_v3  ;;  %1195 = vmatprep.subr.bf16.mxu0 %v1289_v45  ;;  %s1632_s23 = scalar_lea.vmem [#allocation4], %s1762_s25  ;;  %s1337_s25 = scalar_lea.vmem %s1336_s22, 2048 }
  0x1d   : > { %s979_s14 = sshll.u32 %s1632_s23, 4  ;;  %s1658_s14 = int_to_ptr.vmem [resolvable:$true] %s979_s14 }
  0x1e   : > { %1176 = vmatmul.mubr.msk.bf16.vlgmr.msra.gmra.mxu0 %vm425_vm0, %v1283_v6  ;;  %s1331_s17 = scalar_lea.vmem %s1658_s14, 1024  ;;  %p1338_p0 = scmp.lt.s32.totalorder %s1658_s14, %s1336_s22 }
  0x1f   : > { %1188 = vmatmul.mubr.msk.bf16.vlgmr.msra.gmra.mxu1 %vm425_vm0, %v1546_v7  ;;  %1179 = vmatprep.mubr.msk.bf16.mxu0 %vm425_vm0, %v1285_v8  ;;  %p1332_p11 = scmp.ne.s32.totalorder %s1658_s14, %s1331_s17  ;;  %p1339_p1 = scmp.lt.s32.totalorder %s1337_s25, %s1331_s17 }
  0x20   : > { %1191 = vmatprep.mubr.msk.bf16.mxu1 %vm425_vm0, %v1551_v9  ;;  %1196 = vmatpush3.bf16.msra.mxu0 %v1289_v45 }
  0x21   : > { %1197 = vmatprep.subr.bf16.mxu0 %v1290_v46  ;;  %p1333_p12 = pnand %p1332_p11, %p1515_p5  ;;  %p1340_p2 = por %p1339_p1, %p1338_p0 }
  0x23   : > { %p1334_p13 = pneg %p1333_p12 }
  0x24   : > { %1198 = vmatpush3.bf16.msra.mxu0 %v1290_v46 }
  0x25   : > { %p1341_p3 = pnand %p1340_p2, %p1334_p13 }
  0x26   : > { %1180 = vmatmul.mubr.msk.bf16.gmra.mxu0 %vm425_vm0, %v1287_v10 }
  0x27   : > { %1192 = vmatmul.mubr.msk.bf16.gmra.mxu1 %vm425_vm0, %v1556_v11 }
  0x28   : > { %1223 = vmatprep.mubr.msk.bf16.mxu1 %vm425_vm0, %v1282_v5 }
  0xde   : > { %v1177_v12 = vpop.f32.mrf.mxu0 }
  0xdf   : > { %v1189_v13 = vpop.f32.mrf.mxu1 }
  0xe0   : > { %v590_v15 = vadd.f32 %v1189_v13, %v1177_v12  ;;  %v472_v16 = vpop.f32.mrf.mxu0 }
  0xe1   : > { %v581_v17 = vpop.f32.mrf.mxu1 }
  0xe2   : > { %v582_v18 = vadd.f32 %v581_v17, %v472_v16  ;;  %v1178_v19 = vpop.f32.mrf.mxu0  ;;  %v621_v20 = vadd.f32 %v1115_v14, %v590_v15  ;;  %v1291_v15 = vld [vmem:[%s1758_s6 + $0x28] sm:$0xff]  }
  0xe3   : > { %v1190_v21 = vpop.f32.mrf.mxu1  ;;  %1199 = vmatprep.subr.bf16.mxu0 %v1291_v15 }
  0xe4   : > { %v593_v22 = vadd.f32 %v1190_v21, %v1178_v19  ;;  %631 = vmax.xlane.f32.xlu1 %v621_v20  ;;  %v475_v23 = vpop.f32.mrf.mxu0  ;;  %v619_v24 = vadd.f32 %v1115_v14, %v582_v18  ;;  %1200 = vmatpush3.bf16.msra.mxu0 %v1291_v15  ;;  %v1292_v19 = vld [vmem:[%s1758_s6 + $0x20] sm:$0xff]   ;;  %v1294_v21 = vld [vmem:[%s1758_s6 + $0x18] sm:$0xff]  }
  0xe5   : > { %v584_v25 = vpop.f32.mrf.mxu1  ;;  %1201 = vmatprep.subr.bf16.mxu0 %v1292_v19 }
  0xe6   : > { %v585_v26 = vadd.f32 %v584_v25, %v475_v23  ;;  %627 = vmax.xlane.f32.xlu0 %v619_v24  ;;  %v1181_v27 = vpop.f32.mrf.mxu0  ;;  %v622_v28 = vadd.f32 %v1115_v14, %v593_v22  ;;  %v1295_v22 = vld [vmem:[%s1758_s6 + $0x10] sm:$0xff]   ;;  %v1296_v23 = vld [vmem:[%s1757_s5] sm:$0xff]  }
  0xe7   : > { %v1193_v29 = vpop.f32.mrf.mxu1  ;;  %v1298_v25 = vld [vmem:[%s1758_s6] sm:$0xff]  }
  0xe8   : > { %633 = vmax.xlane.f32.xlu1 %v622_v28  ;;  %v488_v30 = vpop.f32.mrf.mxu0  ;;  %v620_v31 = vadd.f32 %v1115_v14, %v585_v26  ;;  %v606_v36 = vadd.f32 %v1193_v29, %v1181_v27  ;;  %1202 = vmatpush3.bf16.msra.mxu0 %v1292_v19 }
  0xe9   : > { %v597_v32 = vpop.f32.mrf.mxu1  ;;  %1203 = vmatprep.subr.bf16.mxu0 %v1294_v21 }
  0xea   : > { %v598_v33 = vadd.f32 %v597_v32, %v488_v30  ;;  %629 = vmax.xlane.f32.xlu0 %v620_v31  ;;  %v1182_v34 = vpop.f32.mrf.mxu0  ;;  %v625_v43 = vadd.f32 %v1115_v14, %v606_v36 }
  0xeb   : > { %v1194_v35 = vpop.f32.mrf.mxu1 }
  0xec   : > { %v491_v37 = vpop.f32.mrf.mxu0  ;;  %v623_v38 = vadd.f32 %v1115_v14, %v598_v33  ;;  %v609_v41 = vadd.f32 %v1194_v35, %v1182_v34  ;;  %1204 = vmatpush3.bf16.msra.mxu0 %v1294_v21 }
  0xed   : > { %v600_v39 = vpop.f32.mrf.mxu1  ;;  %1205 = vmatprep.subr.bf16.mxu0 %v1295_v22 }
  0xee   : > { %v601_v40 = vadd.f32 %v600_v39, %v491_v37  ;;  %635 = vmax.xlane.f32.xlu0 %v623_v38  ;;  %v626_v44 = vadd.f32 %v1115_v14, %v609_v41 }
  0xf0   : > { %v624_v42 = vadd.f32 %v1115_v14, %v601_v40  ;;  %1206 = vmatpush3.bf16.msra.mxu0 %v1295_v22 }
  0xf2   : > { %637 = vmax.xlane.f32.xlu1 %v624_v42  ;;  %639 = vmax.xlane.f32.xlu0 %v625_v43 }
  0xf6   : > { %641 = vmax.xlane.f32.xlu1 %v626_v44 }
 0x16d   : > { %v632_v47 = vpop.xlane.xlu1 %631 }
 0x16e   : > { %v645_v48 = vsub.f32 %v621_v20, %v632_v47  ;;  %v1293_v20 = vld [vmem:[%s1757_s5 + $0x8] sm:$0xff]  }
 0x16f   : > { %v628_v49 = vpop.xlane.xlu0 %627  ;;  %1219 = vmatprep.subr.bf16.mxu1 %v1293_v20 }
 0x170   : > { %v643_v50 = vsub.f32 %v619_v24, %v628_v49  ;;  %v655_v53 = vmul.f32 1.442695, %v645_v48  ;;  %1220 = vmatpush3.bf16.msra.mxu1 %v1293_v20  ;;  %v1297_v24 = vld [vmem:[%s1758_s6 + $0x8] sm:$0xff]  }
 0x171   : > { %v634_v51 = vpop.xlane.xlu1 %633  ;;  %1221 = vmatprep.subr.bf16.mxu1 %v1296_v23  ;;  %1207 = vmatprep.subr.bf16.mxu0 %v1297_v24 }
 0x172   : > { %v651_v52 = vmul.f32 1.442695, %v643_v50  ;;  %v646_v54 = vsub.f32 %v622_v28, %v634_v51  ;;  %1208 = vmatpush3.bf16.msra.mxu0 %v1297_v24 }
 0x173   : > { %v630_v55 = vpop.xlane.xlu0 %629  ;;  %1209 = vmatprep.subr.bf16.mxu0 %v1298_v25 }
 0x174   : > { %1299 = vpow2.f32 %v651_v52  ;;  %v644_v56 = vsub.f32 %v620_v31, %v630_v55  ;;  %v657_v58 = vmul.f32 1.442695, %v646_v54  ;;  %1222 = vmatpush3.bf16.msra.mxu1 %v1296_v23 }
 0x175   : > { %1301 = vpow2.f32 %v655_v53 }
 0x176   : > { %v653_v57 = vmul.f32 1.442695, %v644_v56  ;;  %1210 = vmatpush3.bf16.msra.mxu0 %v1298_v25 }
 0x177   : > { %v636_v59 = vpop.xlane.xlu0 %635  ;;  %1224 = vmatmul.mubr.msk.bf16.vlgmr.msra.gmra.mxu1 %vm425_vm0, %v1546_v7 }
 0x178   : > { %1303 = vpow2.f32 %v653_v57  ;;  %v647_v60 = vsub.f32 %v623_v38, %v636_v59  ;;  %1227 = vmatprep.mubr.msk.bf16.mxu1 %vm425_vm0, %v1551_v9 }
 0x179   : > { %1305 = vpow2.f32 %v657_v58 }
 0x17a   : > { %v659_v61 = vmul.f32 1.442695, %v647_v60 }
 0x17b   : > { %v638_v62 = vpop.xlane.xlu1 %637  ;;  %v640_v63 = vpop.xlane.xlu0 %639 }
 0x17c   : > { %1307 = vpow2.f32 %v659_v61  ;;  %v648_v0 = vsub.f32 %v624_v42, %v638_v62  ;;  %v649_v1 = vsub.f32 %v625_v43, %v640_v63 }
 0x17e   : > { %v661_v2 = vmul.f32 1.442695, %v648_v0  ;;  %v663_v3 = vmul.f32 1.442695, %v649_v1 }
 0x17f   : > { %v642_v4 = vpop.xlane.xlu1 %641  ;;  %1228 = vmatmul.mubr.msk.bf16.gmra.mxu1 %vm425_vm0, %v1556_v11 }
 0x180   : > { %1309 = vpow2.f32 %v661_v2  ;;  %v650_v5 = vsub.f32 %v626_v44, %v642_v4 }
 0x181   : > { %v1571_v6 = vpop.eup %1299  ;;  %1311 = vpow2.f32 %v663_v3 }
 0x182   : > { %v665_v8 = vmul.f32 1.442695, %v650_v5  ;;  %667 = vadd.xlane.f32.xlu0 %v1571_v6  ;;  %v1574_v10 = vpop.eup %1301 }
 0x184   : > { %1313 = vpow2.f32 %v665_v8 }
 0x185   : > { %v1576_v12 = vpop.eup %1303 }
 0x186   : > { %671 = vadd.xlane.f32.xlu0 %v1574_v10  ;;  %669 = vadd.xlane.f32.xlu1 %v1576_v12  ;;  %v1580_v13 = vpop.eup %1305 }
 0x189   : > { %v1582_v14 = vpop.eup %1307 }
 0x18a   : > { %673 = vadd.xlane.f32.xlu1 %v1580_v13  ;;  %675 = vadd.xlane.f32.xlu0 %v1582_v14 }
 0x18d   : > { %v1589_v16 = vpop.eup %1309 }
 0x18e   : > { %v1591_v17 = vpop.eup %1311  ;;  %677 = vadd.xlane.f32.xlu1 %v1589_v16 }
 0x18f   : > { %679 = vadd.xlane.f32.xlu0 %v1591_v17 }
 0x191   : > { %v1595_v18 = vpop.eup %1313 }
 0x192   : > { %681 = vadd.xlane.f32.xlu1 %v1595_v18 }
 0x20b   : > { %v668_v26 = vpop.xlane.xlu0 %667 }
 0x20c   : > { %1315 = vrcp.f32 %v668_v26 }
 0x20f   : > { %v670_v27 = vpop.xlane.xlu1 %669  ;;  %v672_v28 = vpop.xlane.xlu0 %671 }
 0x210   : > { %1317 = vrcp.f32 %v670_v27 }
 0x211   : > { %1319 = vrcp.f32 %v672_v28 }
 0x213   : > { %v674_v29 = vpop.xlane.xlu1 %673  ;;  %v676_v30 = vpop.xlane.xlu0 %675 }
 0x214   : > { %1321 = vrcp.f32 %v674_v29 }
 0x215   : > { %1323 = vrcp.f32 %v676_v30 }
 0x217   : > { %v678_v7 = vpop.xlane.xlu1 %677 }
 0x218   : > { %1325 = vrcp.f32 %v678_v7  ;;  %v680_v9 = vpop.xlane.xlu0 %679 }
 0x219   : > { %v1316_v31 = vpop.eup %1315  ;;  %1327 = vrcp.f32 %v680_v9 }
 0x21a   : > { %v691_v11 = vmul.f32 %v1316_v31, %v1571_v6 }
 0x21b   : > { %v682_v32 = vpop.xlane.xlu1 %681 }
 0x21c   : > { %1329 = vrcp.f32 %v682_v32  ;;  %699 = vst [vmem:[%s1632_s23] sm:$0xff] %v691_v11 }
 0x21d   : > { %v1318_v33 = vpop.eup %1317 }
 0x21e   : > { %v1320_v34 = vpop.eup %1319  ;;  %v692_v35 = vmul.f32 %v1318_v33, %v1576_v12 }
 0x21f   : > { %v693_v36 = vmul.f32 %v1320_v34, %v1574_v10 }
 0x220   : > { %700 = vst [vmem:[%s1632_s23 + $0x8] sm:$0xff] %v692_v35  ;;  %v711_v37 = vpack.c.bf16 %v692_v35, %v691_v11 }
 0x221   : > { %v1322_v38 = vpop.eup %1321  ;;  %701 = vst [vmem:[%s1632_s23 + $0x10] sm:$0xff] %v693_v36 }
 0x222   : > { %v1324_v39 = vpop.eup %1323  ;;  %1211 = vmatprep.mubr.bf16.mxu0 %v711_v37  ;;  %v694_v40 = vmul.f32 %v1322_v38, %v1580_v13 }
 0x223   : > { %v695_v41 = vmul.f32 %v1324_v39, %v1582_v14 }
 0x224   : > { %702 = vst [vmem:[%s1632_s23 + $0x18] sm:$0xff] %v694_v40  ;;  %v712_v42 = vpack.c.bf16 %v694_v40, %v693_v36 }
 0x225   : > { %v1326_v43 = vpop.eup %1325  ;;  %703 = vst [vmem:[%s1632_s23 + $0x20] sm:$0xff] %v695_v41 }
 0x226   : > { %v1328_v44 = vpop.eup %1327  ;;  %1212 = vmatmul.mubr.bf16.vlgmr.msra.gmra.mxu0 %v712_v42  ;;  %v696_v45 = vmul.f32 %v1326_v43, %v1589_v16 }
 0x227   : > { %v697_v46 = vmul.f32 %v1328_v44, %v1591_v17 }
 0x228   : > { %704 = vst [vmem:[%s1632_s23 + $0x28] sm:$0xff] %v696_v45  ;;  %v713_v47 = vpack.c.bf16 %v696_v45, %v695_v41 }
 0x229   : > { %v1330_v48 = vpop.eup %1329  ;;  %705 = vst [vmem:[%s1632_s23 + $0x30] sm:$0xff] %v697_v46 }
 0x22a   : > { %1215 = vmatprep.mubr.bf16.mxu0 %v713_v47  ;;  %v698_v49 = vmul.f32 %v1330_v48, %v1595_v18 }
 0x22c   : > { %706 = vst [vmem:[%s1632_s23 + $0x38] sm:$0xff] %v698_v49  ;;  %v714_v50 = vpack.c.bf16 %v698_v49, %v697_v46 }
 0x22e   : > { %1216 = vmatmul.mubr.bf16.gmra.mxu0 %v714_v50 }
 0x22f   : > { %1344 = shalt.err (!%p1341_p3)
}
 0x230   : > { %s1345_s23 = scalar_lea.hbm %s1655_s29, 1024  ;;  %s1349_s21 = scalar_lea.hbm %s1761_s9, 4096 }
 0x231   : > { %p1346_p4 = scmp.ne.s32.totalorder %s1655_s29, %s1345_s23  ;;  %p1350_p9 = scmp.lt.s32.totalorder %s1655_s29, %s1761_s9 }
 0x232   : > { %p1351_p10 = scmp.lt.s32.totalorder %s1349_s21, %s1345_s23 }
 0x233   : > { %p1347_p7 = pnand %p1346_p4, %p1515_p5 }
 0x234   : > { %p1352_p11 = por %p1351_p10, %p1350_p9 }
 0x235   : > { %p1348_p8 = pneg %p1347_p7 }
 0x237   : > { %p1353_p12 = pnand %p1352_p11, %p1348_p8 }
 0x239   : > { %1356 = shalt.err (!%p1353_p12)
}
 0x23a   : > { %s1764_s25 = smov 128   ;;  %s1425_s17 = smov 8   ;;  %v1225_v51 = vpop.f32.mrf.mxu1  ;;  %v1130_v56 = vld [vmem:[%s1759_s7] ss:$0 sm:$0xff] }
 0x23b   : > { %s1767_s22 = scalar_lea.sflag [#allocation5], %s1626_s24  ;;  %s1768_s23 = sshll.u32 %s1626_s24, 6 }
 0x23c   : > { %1232 = dma.vmem_to_hbm [thread:$0]  (%p1515_p5), %s1658_s14, 1024, %s1655_s29, %s1767_s22, %s1764_s25, %s1764_s25, %s1425_s17   ;;  %v890_v52 = vpop.f32.mrf.mxu1 }
 0x23d   : > { %s1691_s27 = scalar_lea.vmem [#allocation2], %s1768_s23  ;;  %s1769_s14 = sshll.u32 %s1498_s13, 10 }
 0x23e   : > { %v1226_v53 = vpop.f32.mrf.mxu1  ;;  %s963_s29 = sshll.u32 %s1691_s27, 4  ;;  %s1706_s22 = scalar_lea.hbm %s1760_s8, %s1769_s14  ;;  %s1708_s29 = int_to_ptr.vmem [resolvable:$true] %s963_s29 }
 0x23f   : > { %s945_s26 = scalar_lea.sflag [#allocation3], %s1626_s24  ;;  %s1357_s16 = scalar_lea.vmem %s1708_s29, 1024 }
 0x240   : > { %v893_v54 = vpop.f32.mrf.mxu1  ;;  %p1358_p13 = scmp.ne.s32.totalorder %s1708_s29, %s1357_s16  ;;  %s1426_s23 = smov [#allocation2]  }
 0x241   : > { %s1361_s25 = sshll.u32 %s1426_s23, 4  ;;  %s1362_s25 = int_to_ptr.vmem [resolvable:$false] %s1361_s25 }
 0x242   : > { %v1229_v59 = vpop.f32.mrf.mxu1  ;;  %p1359_p0 = pnand %p1358_p13, %p1515_p5  ;;  %s1363_s13 = scalar_lea.vmem %s1362_s25, 2048 }
 0x243   : > { %p1364_p2 = scmp.lt.s32.totalorder %s1708_s29, %s1362_s25  ;;  %p1365_p3 = scmp.lt.s32.totalorder %s1363_s13, %s1357_s16 }
 0x244   : > { %v906_v1 = vpop.f32.mrf.mxu1  ;;  %p1360_p1 = pneg %p1359_p0 }
 0x245   : > { %p1366_p4 = por %p1365_p3, %p1364_p2 }
 0x246   : > { %v1230_v10 = vpop.f32.mrf.mxu1 }
 0x247   : > { %p1367_p7 = pnand %p1366_p4, %p1360_p1 }
 0x248   : > { %v909_v18 = vpop.f32.mrf.mxu1 }
 0x2e6   : > { %v1213_v55 = vpop.f32.mrf.mxu0 }
 0x2e7   : > { %v899_v57 = vadd.f32 %v1225_v51, %v1213_v55 }
 0x2e8   : > { %v813_v58 = vpop.f32.mrf.mxu0 }
 0x2e9   : > { %v930_v60 = vadd.f32 %v1130_v56, %v899_v57  ;;  %v891_v61 = vadd.f32 %v890_v52, %v813_v58 }
 0x2ea   : > { %v1214_v62 = vpop.f32.mrf.mxu0 }
 0x2eb   : > { %938 = vst [vmem:[%s1691_s27 + $0x10] sm:$0xff] %v930_v60  ;;  %v928_v63 = vadd.f32 %v1130_v56, %v891_v61  ;;  %v902_v0 = vadd.f32 %v1226_v53, %v1214_v62 }
 0x2ec   : > { %v816_v2 = vpop.f32.mrf.mxu0 }
 0x2ed   : > { %936 = vst [vmem:[%s1691_s27] sm:$0xff] %v928_v63  ;;  %v931_v3 = vadd.f32 %v1130_v56, %v902_v0  ;;  %v894_v4 = vadd.f32 %v893_v54, %v816_v2 }
 0x2ee   : > { %v1217_v5 = vpop.f32.mrf.mxu0 }
 0x2ef   : > { %939 = vst [vmem:[%s1691_s27 + $0x18] sm:$0xff] %v931_v3  ;;  %v929_v6 = vadd.f32 %v1130_v56, %v894_v4  ;;  %v915_v8 = vadd.f32 %v1229_v59, %v1217_v5 }
 0x2f0   : > { %v829_v12 = vpop.f32.mrf.mxu0 }
 0x2f1   : > { %937 = vst [vmem:[%s1691_s27 + $0x8] sm:$0xff] %v929_v6  ;;  %v934_v13 = vadd.f32 %v1130_v56, %v915_v8  ;;  %v907_v14 = vadd.f32 %v906_v1, %v829_v12 }
 0x2f2   : > { %v1218_v15 = vpop.f32.mrf.mxu0 }
 0x2f3   : > { %942 = vst [vmem:[%s1691_s27 + $0x30] sm:$0xff] %v934_v13  ;;  %v932_v16 = vadd.f32 %v1130_v56, %v907_v14  ;;  %v918_v17 = vadd.f32 %v1230_v10, %v1218_v15 }
 0x2f4   : > { %v832_v19 = vpop.f32.mrf.mxu0 }
 0x2f5   : > { %940 = vst [vmem:[%s1691_s27 + $0x20] sm:$0xff] %v932_v16  ;;  %v935_v20 = vadd.f32 %v1130_v56, %v918_v17  ;;  %v910_v21 = vadd.f32 %v909_v18, %v832_v19 }
 0x2f7   : > { %943 = vst [vmem:[%s1691_s27 + $0x38] sm:$0xff] %v935_v20  ;;  %v933_v22 = vadd.f32 %v1130_v56, %v910_v21 }
 0x2f9   : > { %941 = vst [vmem:[%s1691_s27 + $0x28] sm:$0xff] %v933_v22 }
 0x2fa   : > { %1370 = shalt.err (!%p1367_p7)
}
 0x2fb   : > { %s1371_s27 = scalar_lea.hbm %s1706_s22, 1024  ;;  %s1375_s28 = scalar_lea.hbm %s1760_s8, 4096 }
 0x2fc   : > { %p1372_p8 = scmp.ne.s32.totalorder %s1706_s22, %s1371_s27  ;;  %p1376_p11 = scmp.lt.s32.totalorder %s1706_s22, %s1760_s8 }
 0x2fd   : > { %p1377_p12 = scmp.lt.s32.totalorder %s1375_s28, %s1371_s27 }
 0x2fe   : > { %p1373_p9 = pnand %p1372_p8, %p1515_p5 }
 0x2ff   : > { %p1378_p13 = por %p1377_p12, %p1376_p11 }
 0x300   : > { %p1374_p10 = pneg %p1373_p9 }
 0x302   : > { %p1379_p0 = pnand %p1378_p13, %p1374_p10 }
 0x304   : > { %1382 = shalt.err (!%p1379_p0)
}
 0x305   : > { %s1770_s25 = smov 128  }
 0x306   : > { %1231 = dma.vmem_to_hbm [thread:$0]  (%p1515_p5), %s1708_s29, 1024, %s1706_s22, %s945_s26, %s1770_s25, %s1770_s25, %s1425_s17  }
 0x307 PF: > { %p1242_p1 = scmp.ge.s32.totalorder %s1421_s12, 2  ;;  %s994_s16 = sand.u32 1, %s1409_s30  }
 0x308   : > { %s995_s13 = scalar_lea.sflag [#allocation3], %s994_s16 }
 0x309   : > { %p1236_p2 = pnand %p1242_p1, %p1519_p6 }
 0x30b   : > { %p1237_p3 = pneg %p1236_p2 }
 0x30d   : > { %1400 = dma.done.wait (%p1237_p3), %s995_s13, 1024  }
 0x30e   : > { %1402 = vsyncadd (%p1237_p3), %s995_s13, 4294966272  ;;  %s1004_s27 = scalar_lea.sflag [#allocation5], %s994_s16 }
 0x30f   : > { %1404 = dma.done.wait (%p1237_p3), %s1004_s27, 1024  }
 0x310   : > { %1406 = vsyncadd (%p1237_p3), %s1004_s27, 4294966272  ;;  %p23_p5 = scmp.ge.s32.totalorder %s1502_s15, 6   ;;  %s1771_s30 = smov %s1413_s10 }
 0x311   : > { %s1772_s10 = smov %s1417_s11  ;;  %s1773_s11 = smov %s1513_s18 }
 0x312   : > { %s1774_s12 = smov %s1502_s15  ;;  %25 = sbr.rel (!%p23_p5) target bundleno = 5 (0x5), region = 107 }
 0x317   :  { %1009 = vsyncpa [#allocation3], 1 }
 0x318   :  { %1011 = vsyncpa [#allocation3 + $0x1], 1 }
 0x319   :  { %1012 = vsyncpa [#allocation5], 1 }
 0x31a   :  { %1014 = vsyncpa [#allocation5 + $0x1], 1 }

</bundles_post_ra>
